<compile_context>
chip_gen: v6e
topology: v6e:2x2x1
jax: 0.10.0
libtpu: 0.0.40
codegen_flags: <defaults>
</compile_context>

<pallas_src>
import functools

import jax
import jax.numpy as jnp
from jax.experimental import pallas as pl
from jax.experimental.pallas import tpu as pltpu

LN_EPS = 1e-5
_VMEM_BUDGET_BYTES = 12 * 1024 * 1024  # conservative: under 16 MiB v5e scoped default


def _edge_pruning_kernel(x_ref, w1_ref, vec_ref, w2_ref, scal_ref,
                         mask_ref, scores_ref, *, training, gelu_approximate):
    # x:   (edge_dim, TE)          w1:  (H, edge_dim)
    # vec: (H, 3) = [b1 | ln_gamma | ln_beta]
    # w2:  (1, H)                  scal: (1, 3) = [b2, threshold, temperature]
    # mask/scores: (1, TE)
    x = x_ref[...].astype(jnp.float32)
    w1 = w1_ref[...].astype(jnp.float32)
    vec = vec_ref[...].astype(jnp.float32)
    b1, ln_g, ln_b = vec[:, 0:1], vec[:, 1:2], vec[:, 2:3]

    # Linear 1 on the MXU: (H, edge_dim) @ (edge_dim, TE) -> (H, TE)
    h = jnp.dot(w1, x, preferred_element_type=jnp.float32) + b1

    # LayerNorm over the feature (sublane) axis, biased variance, eps=1e-5.
    mean = jnp.mean(h, axis=0, keepdims=True)
    var = jnp.mean(jnp.square(h - mean), axis=0, keepdims=True)
    h = (h - mean) * jax.lax.rsqrt(var + LN_EPS)
    h = h * ln_g + ln_b

    # GELU. approximate=True -> tanh on the EUP slot (review: VPU is the
    # saturating unit with exact erf). approximate=False = PyTorch default.
    act = jax.nn.gelu(h, approximate=gelu_approximate)
    # TODO(synk): nn.Dropout is stochastic in torch train mode; applied as
    # identity here (would need pltpu.prng_seed/prng_random_bits for parity).

    scal = scal_ref[...].astype(jnp.float32)
    b2, thr, temp = scal[:, 0:1], scal[:, 1:2], scal[:, 2:3]

    # Linear 2 on the MXU: (1, H) @ (H, TE) -> (1, TE), then Sigmoid.
    scores = jnp.dot(w2_ref[...].astype(jnp.float32), act,
                     preferred_element_type=jnp.float32) + b2
    scores = jax.nn.sigmoid(scores)

    if training:
        mask = jax.nn.sigmoid((scores - thr) * temp)     # soft, differentiable
    else:
        mask = (scores > thr).astype(jnp.float32)        # hard 0/1 mask

    scores_ref[...] = scores.astype(scores_ref.dtype)
    mask_ref[...] = mask.astype(mask_ref.dtype)


def _num_tensorcores():
    """Heuristic number of TensorCores sharing a 'parallel' grid axis.

    v5e/v6e expose 1 TC per device; v4/v5p (megacore) and v7x expose 2.
    Unknown kinds fall back to 1 (only costs a missed split, never a failure).
    """
    try:
        kind = jax.devices()[0].device_kind.lower()
    except Exception:
        return 1
    for tag in ("v7", "v4", "v5p"):
        if tag in kind:
            return 2
    return 1


def _pick_tile(E, edge_dim, tile_edges, in_itemsize, num_cores,
               vmem_budget_bytes):
    """Edge-tile size: multiple of 128, VMEM-capped, core-balanced."""
    # Per-edge-column VMEM: double-buffered input + 2 outputs * 2 buffers with
    # (1, te) sublane padding to 8 rows of f32.
    per_edge = 2 * edge_dim * in_itemsize + 2 * 2 * 8 * 4
    te_cap = max(128, (vmem_budget_bytes // per_edge) // 128 * 128)

    te = max(128, (int(tile_edges) // 128) * 128)
    te = min(te, te_cap)
    te = min(te, pl.cdiv(E, 128) * 128)

    # Block-count target: 1 block per TensorCore is enough for this kernel;
    # forcing more only multiplies the ~0.35us per-grid-step overhead.
    target_blocks = num_cores if E >= num_cores * 128 else 1
    nb = max(pl.cdiv(E, te), target_blocks)
    if num_cores > 1:
        nb = pl.cdiv(nb, num_cores) * num_cores   # even split across cores
    te = max(128, min(te, pl.cdiv(pl.cdiv(E, nb), 128) * 128))
    return te


def dynamic_edge_pruning_pallas(edge_attr, params, edge_index=None, *,
                                training=True, tile_edges=32768,
                                stream_dtype=None, gelu_approximate=True,
                                features_major=False, num_cores=None,
                                vmem_budget_bytes=_VMEM_BUDGET_BYTES):
    """Pallas equivalent of DynamicEdgePruning.forward.

    edge_attr: (E, edge_dim) like the PyTorch module, or (edge_dim, E) with
      features_major=True (preferred: avoids the wrapper transpose HBM pass).
    stream_dtype: e.g. jnp.bfloat16 halves HBM read bytes (and the transpose's
      write bytes); compute stays f32 in-kernel. Keep None (f32) when exact
      eval-mode threshold parity matters.
    Returns (pruned_mask [E, 1], edge_scores [E, 1]).
    """
    del edge_index  # accepted for API parity; unused by the module's forward

    if features_major:
        edge_dim, E = edge_attr.shape
        x_t = edge_attr
    else:
        E, edge_dim = edge_attr.shape
        # Standalone transpose pass; pass features_major data upstream to
        # avoid it entirely, or set stream_dtype=bf16 to halve its writes.
        x_t = edge_attr.T
    out_dtype = edge_attr.dtype
    if stream_dtype is not None and x_t.dtype != stream_dtype:
        x_t = x_t.astype(stream_dtype)

    hidden = params["w1"].shape[0]
    if num_cores is None:
        num_cores = _num_tensorcores()

    te = _pick_tile(E, edge_dim, tile_edges, jnp.dtype(x_t.dtype).itemsize,
                    num_cores, vmem_budget_bytes)
    grid = (pl.cdiv(E, te),)

    # Resident parameter blocks.
    w1 = params["w1"]
    vec = jnp.stack([params["b1"].reshape(-1),
                     params["ln_g"].reshape(-1),
                     params["ln_b"].reshape(-1)], axis=1)        # (H, 3)
    w2_row = params["w2"].reshape(1, hidden)                     # (1, H)
    scal = jnp.stack([params["b2"].reshape(()),
                      params["threshold"].reshape(()),
                      params["temperature"].reshape(())]).reshape(1, 3)
    scal = scal.astype(jnp.float32)

    kernel = functools.partial(_edge_pruning_kernel, training=training,
                               gelu_approximate=gelu_approximate)

    mask_t, scores_t = pl.pallas_call(
        kernel,
        out_shape=(jax.ShapeDtypeStruct((1, E), out_dtype),
                   jax.ShapeDtypeStruct((1, E), out_dtype)),
        grid_spec=pltpu.PrefetchScalarGridSpec(
            num_scalar_prefetch=0,
            grid=grid,
            in_specs=[
                pl.BlockSpec((edge_dim, te), lambda i: (0, i)),      # edge feats
                pl.BlockSpec((hidden, edge_dim), lambda i: (0, 0)),  # W1 resident
                pl.BlockSpec((hidden, 3), lambda i: (0, 0)),         # [b1|g|beta]
                pl.BlockSpec((1, hidden), lambda i: (0, 0)),         # W2 row
                pl.BlockSpec((1, 3), lambda i: (0, 0)),              # [b2,thr,temp]
            ],
            out_specs=[
                pl.BlockSpec((1, te), lambda i: (0, i)),             # mask
                pl.BlockSpec((1, te), lambda i: (0, i)),             # scores
            ],
        ),
        # Tile sizing keeps the per-step working set under ~12 MiB, inside
        # every generation's scoped-VMEM default; no vmem_limit_bytes needed.
        compiler_params=pltpu.CompilerParams(
            dimension_semantics=("parallel",)),
    )(x_t, w1, vec, w2_row, scal)

    # (1, E) -> (E, 1) is a metadata-only reshape (same row-major bytes).
    # (mask, scores) are kept as two [1, E] outputs instead of one [2, E]
    # block: both are already lane-dense, and splitting a stacked output in
    # the wrapper would re-add an HBM slice pass.
    return mask_t.reshape(E, 1), scores_t.reshape(E, 1)


def init_params(key, edge_dim, hidden_dim=None, init_threshold=0.5,
                dtype=jnp.float32):
    """Synthetic parameters mirroring DynamicEdgePruning.__init__.

    W1 is (out, in); W2 is stored as a (1, hidden) row so the kernel's second
    MXU matmul consumes it directly."""
    hidden_dim = hidden_dim or edge_dim * 2
    k1, k2, k3, k4 = jax.random.split(key, 4)
    lim1 = 1.0 / (edge_dim ** 0.5)
    w1 = jax.random.uniform(k1, (hidden_dim, edge_dim), dtype, -lim1, lim1)
    b1 = jax.random.uniform(k2, (hidden_dim,), dtype, -lim1, lim1)
    ln_g = jnp.ones((hidden_dim,), dtype)
    ln_b = jnp.zeros((hidden_dim,), dtype)
    lim2 = 1.0 / (hidden_dim ** 0.5)
    w2 = jax.random.uniform(k3, (1, hidden_dim), dtype, -lim2, lim2)
    b2 = jax.random.uniform(k4, (1,), dtype, -lim2, lim2)
    return dict(w1=w1, b1=b1, ln_g=ln_g, ln_b=ln_b, w2=w2, b2=b2,
                threshold=jnp.array([init_threshold], dtype),
                temperature=jnp.array([10.0], dtype))


def dynamic_edge_pruning_ref(edge_attr, params, training=True,
                             gelu_approximate=False):
    """Pure-JAX reference (gelu_approximate=False == PyTorch nn.GELU default)."""
    h = edge_attr @ params["w1"].T + params["b1"]
    mean = h.mean(-1, keepdims=True)
    var = ((h - mean) ** 2).mean(-1, keepdims=True)
    h = (h - mean) / jnp.sqrt(var + LN_EPS)
    h = h * params["ln_g"] + params["ln_b"]
    h = jax.nn.gelu(h, approximate=gelu_approximate)
    scores = jax.nn.sigmoid(h @ params["w2"].reshape(-1, 1) + params["b2"])
    if training:
        mask = jax.nn.sigmoid((scores - params["threshold"]) *
                              params["temperature"])
    else:
        mask = (scores > params["threshold"]).astype(scores.dtype)
    return mask, scores


if __name__ == "__main__":
    edge_dim = 8
    num_edges = 600          # not a multiple of 128 -> exercises the ragged tail
    num_nodes = 64

    key = jax.random.PRNGKey(0)
    ke, ki, kp = jax.random.split(key, 3)
    edge_attr = jax.random.normal(ke, (num_edges, edge_dim), jnp.float32)
    edge_index = jax.random.randint(ki, (2, num_edges), 0, num_nodes, jnp.int32)
    params = init_params(kp, edge_dim)

    # Default path: tanh-GELU (EUP), training=True soft mask.
    mask_tr, scores_tr = dynamic_edge_pruning_pallas(
        edge_attr, params, edge_index, training=True)
    mask_tr = jax.block_until_ready(mask_tr)

    # Exact-erf GELU path (bit-level PyTorch-default semantics).
    mask_ex, scores_ex = dynamic_edge_pruning_pallas(
        edge_attr, params, edge_index, training=True, gelu_approximate=False)
    mask_ex = jax.block_until_ready(mask_ex)

    # Eval path: hard threshold mask.
    mask_ev, scores_ev = dynamic_edge_pruning_pallas(
        edge_attr, params, edge_index, training=False)
    mask_ev = jax.block_until_ready(mask_ev)

    # Feature-major input path (no wrapper transpose).
    mask_fm, scores_fm = dynamic_edge_pruning_pallas(
        edge_attr.T, params, edge_index, training=True, features_major=True)
    mask_fm = jax.block_until_ready(mask_fm)

    ref_mask_tanh, ref_scores_tanh = dynamic_edge_pruning_ref(
        edge_attr, params, training=True, gelu_approximate=True)
    ref_mask_erf, ref_scores_erf = dynamic_edge_pruning_ref(
        edge_attr, params, training=True, gelu_approximate=False)

    assert mask_tr.shape == (num_edges, 1) and scores_tr.shape == (num_edges, 1)
    # Default kernel (tanh GELU) vs tanh reference: tight.
    assert jnp.allclose(scores_tr, ref_scores_tanh, atol=1e-4, rtol=1e-4)
    assert jnp.allclose(mask_tr, ref_mask_tanh, atol=1e-4, rtol=1e-4)
    # Exact-erf kernel vs PyTorch-default reference: tight.
    assert jnp.allclose(scores_ex, ref_scores_erf, atol=1e-4, rtol=1e-4)
    assert jnp.allclose(mask_ex, ref_mask_erf, atol=1e-4, rtol=1e-4)
    # Default (tanh) vs exact-erf reference: known ~1e-3 approximation gap.
    assert jnp.allclose(scores_tr, ref_scores_erf, atol=5e-3, rtol=5e-3)
    # Eval mask must be exactly the hard threshold of the kernel's own scores.
    assert jnp.array_equal(
        mask_ev, (scores_ev > params["threshold"][0]).astype(mask_ev.dtype))
    # Feature-major path matches the row-major path.
    assert jnp.allclose(scores_fm, scores_tr, atol=1e-6, rtol=1e-6)
    assert jnp.allclose(mask_fm, mask_tr, atol=1e-6, rtol=1e-6)

    print("KERNEL_OK")
</pallas_src>

<mosaic_0001>
module attributes {stable_mosaic.version = 11 : i64} {
  func.func @_edge_pruning_kernel(%arg0: i32, %arg1: memref<8x640xf32, #tpu.memory_space<vmem>>, %arg2: memref<16x8xf32, #tpu.memory_space<vmem>>, %arg3: memref<16x3xf32, #tpu.memory_space<vmem>>, %arg4: memref<1x16xf32, #tpu.memory_space<vmem>>, %arg5: memref<1x3xf32, #tpu.memory_space<vmem>>, %arg6: memref<1x640xf32, #tpu.memory_space<vmem>>, %arg7: memref<1x640xf32, #tpu.memory_space<vmem>>) attributes {dimension_semantics = [#tpu.dimension_semantics<parallel>], iteration_bounds = array<i64: 1>, scalar_prefetch = 0 : i64, scratch_operands = 0 : i64, tpu.core_type = #tpu.core_type<tc>, window_params = [{transform_indices = @transform_0, window_bounds = array<i64: 8, 640>}, {pipeline_mode = #tpu.pipeline_mode<synchronous>, transform_indices = @transform_1, window_bounds = array<i64: 16, 8>}, {pipeline_mode = #tpu.pipeline_mode<synchronous>, transform_indices = @transform_2, window_bounds = array<i64: 16, 3>}, {pipeline_mode = #tpu.pipeline_mode<synchronous>, transform_indices = @transform_3, window_bounds = array<i64: 1, 16>}, {pipeline_mode = #tpu.pipeline_mode<synchronous>, transform_indices = @transform_4, window_bounds = array<i64: 1, 3>}, {transform_indices = @transform_5, window_bounds = array<i64: 1, 640>}, {transform_indices = @transform_6, window_bounds = array<i64: 1, 640>}]} {
    %c0 = arith.constant 0 : index
    %c0_0 = arith.constant 0 : index
    %0 = vector.load %arg1[%c0, %c0_0] : memref<8x640xf32, #tpu.memory_space<vmem>>, vector<8x640xf32>
    %c0_1 = arith.constant 0 : index
    %c0_2 = arith.constant 0 : index
    %1 = vector.load %arg2[%c0_1, %c0_2] : memref<16x8xf32, #tpu.memory_space<vmem>>, vector<16x8xf32>
    %c0_3 = arith.constant 0 : index
    %c0_4 = arith.constant 0 : index
    %2 = vector.load %arg3[%c0_3, %c0_4] : memref<16x3xf32, #tpu.memory_space<vmem>>, vector<16x3xf32>
    %3 = vector.extract_strided_slice %2 {offsets = [0, 0], sizes = [16, 1], strides = [1, 1]} : vector<16x3xf32> to vector<16x1xf32>
    %4 = vector.extract_strided_slice %2 {offsets = [0, 1], sizes = [16, 1], strides = [1, 1]} : vector<16x3xf32> to vector<16x1xf32>
    %5 = vector.extract_strided_slice %2 {offsets = [0, 2], sizes = [16, 1], strides = [1, 1]} : vector<16x3xf32> to vector<16x1xf32>
    %cst = arith.constant dense<0.000000e+00> : vector<16x640xf32>
    %6 = tpu.matmul %1, %0, %cst {dimension_numbers = #tpu.dot_dimension_numbers<[1], [0], [0], [1], [0, 0, 1, 1], [], []>} : vector<16x8xf32>, vector<8x640xf32>, vector<16x640xf32> -> vector<16x640xf32>
    %7 = vector.broadcast %3 : vector<16x1xf32> to vector<16x640xf32>
    %8 = arith.addf %6, %7 : vector<16x640xf32>
    %cst_5 = arith.constant dense<0.000000e+00> : vector<640xf32>
    %9 = vector.multi_reduction <add>, %8, %cst_5 [0] : vector<16x640xf32> to vector<640xf32>
    %10 = vector.shape_cast %9 : vector<640xf32> to vector<1x640xf32>
    %cst_6 = arith.constant 1.600000e+01 : f32
    %11 = vector.broadcast %cst_6 : f32 to vector<1x640xf32>
    %12 = arith.divf %10, %11 : vector<1x640xf32>
    %13 = vector.broadcast %12 : vector<1x640xf32> to vector<16x640xf32>
    %14 = arith.subf %8, %13 : vector<16x640xf32>
    %15 = arith.mulf %14, %14 : vector<16x640xf32>
    %cst_7 = arith.constant dense<0.000000e+00> : vector<640xf32>
    %16 = vector.multi_reduction <add>, %15, %cst_7 [0] : vector<16x640xf32> to vector<640xf32>
    %17 = vector.shape_cast %16 : vector<640xf32> to vector<1x640xf32>
    %cst_8 = arith.constant 1.600000e+01 : f32
    %18 = vector.broadcast %cst_8 : f32 to vector<1x640xf32>
    %19 = arith.divf %17, %18 : vector<1x640xf32>
    %20 = vector.broadcast %12 : vector<1x640xf32> to vector<16x640xf32>
    %21 = arith.subf %8, %20 : vector<16x640xf32>
    %cst_9 = arith.constant 9.99999974E-6 : f32
    %22 = vector.broadcast %cst_9 : f32 to vector<1x640xf32>
    %23 = arith.addf %19, %22 : vector<1x640xf32>
    %24 = math.rsqrt %23 : vector<1x640xf32>
    %25 = vector.broadcast %24 : vector<1x640xf32> to vector<16x640xf32>
    %26 = arith.mulf %21, %25 : vector<16x640xf32>
    %27 = vector.broadcast %4 : vector<16x1xf32> to vector<16x640xf32>
    %28 = arith.mulf %26, %27 : vector<16x640xf32>
    %29 = vector.broadcast %5 : vector<16x1xf32> to vector<16x640xf32>
    %30 = arith.addf %28, %29 : vector<16x640xf32>
    %31 = arith.mulf %30, %30 : vector<16x640xf32>
    %32 = arith.mulf %30, %31 : vector<16x640xf32>
    %cst_10 = arith.constant 4.471500e-02 : f32
    %33 = vector.broadcast %cst_10 : f32 to vector<16x640xf32>
    %34 = arith.mulf %33, %32 : vector<16x640xf32>
    %35 = arith.addf %30, %34 : vector<16x640xf32>
    %cst_11 = arith.constant 0.797884583 : f32
    %36 = vector.broadcast %cst_11 : f32 to vector<16x640xf32>
    %37 = arith.mulf %36, %35 : vector<16x640xf32>
    %38 = math.tanh %37 : vector<16x640xf32>
    %cst_12 = arith.constant 1.000000e+00 : f32
    %39 = vector.broadcast %cst_12 : f32 to vector<16x640xf32>
    %40 = arith.addf %39, %38 : vector<16x640xf32>
    %cst_13 = arith.constant 5.000000e-01 : f32
    %41 = vector.broadcast %cst_13 : f32 to vector<16x640xf32>
    %42 = arith.mulf %41, %40 : vector<16x640xf32>
    %43 = arith.mulf %30, %42 : vector<16x640xf32>
    %c0_14 = arith.constant 0 : index
    %c0_15 = arith.constant 0 : index
    %44 = vector.load %arg5[%c0_14, %c0_15] : memref<1x3xf32, #tpu.memory_space<vmem>>, vector<1x3xf32>
    %45 = vector.extract_strided_slice %44 {offsets = [0, 0], sizes = [1, 1], strides = [1, 1]} : vector<1x3xf32> to vector<1x1xf32>
    %46 = vector.extract_strided_slice %44 {offsets = [0, 1], sizes = [1, 1], strides = [1, 1]} : vector<1x3xf32> to vector<1x1xf32>
    %47 = vector.extract_strided_slice %44 {offsets = [0, 2], sizes = [1, 1], strides = [1, 1]} : vector<1x3xf32> to vector<1x1xf32>
    %c0_16 = arith.constant 0 : index
    %c0_17 = arith.constant 0 : index
    %48 = vector.load %arg4[%c0_16, %c0_17] : memref<1x16xf32, #tpu.memory_space<vmem>>, vector<1x16xf32>
    %cst_18 = arith.constant dense<0.000000e+00> : vector<1x640xf32>
    %49 = tpu.matmul %48, %43, %cst_18 {dimension_numbers = #tpu.dot_dimension_numbers<[1], [0], [0], [1], [0, 0, 1, 1], [], []>} : vector<1x16xf32>, vector<16x640xf32>, vector<1x640xf32> -> vector<1x640xf32>
    %50 = vector.broadcast %45 : vector<1x1xf32> to vector<1x640xf32>
    %51 = arith.addf %49, %50 : vector<1x640xf32>
    %52 = arith.negf %51 : vector<1x640xf32>
    %53 = math.exp %52 : vector<1x640xf32>
    %cst_19 = arith.constant 1.000000e+00 : f32
    %54 = vector.broadcast %cst_19 : f32 to vector<1x640xf32>
    %55 = arith.addf %54, %53 : vector<1x640xf32>
    %56 = arith.divf %54, %55 : vector<1x640xf32>
    %57 = vector.broadcast %46 : vector<1x1xf32> to vector<1x640xf32>
    %58 = arith.subf %56, %57 : vector<1x640xf32>
    %59 = vector.broadcast %47 : vector<1x1xf32> to vector<1x640xf32>
    %60 = arith.mulf %58, %59 : vector<1x640xf32>
    %61 = arith.negf %60 : vector<1x640xf32>
    %62 = math.exp %61 : vector<1x640xf32>
    %cst_20 = arith.constant 1.000000e+00 : f32
    %63 = vector.broadcast %cst_20 : f32 to vector<1x640xf32>
    %64 = arith.addf %63, %62 : vector<1x640xf32>
    %65 = arith.divf %63, %64 : vector<1x640xf32>
    %c0_21 = arith.constant 0 : index
    %c0_22 = arith.constant 0 : index
    %66 = vector.load %arg7[%c0_21, %c0_22] : memref<1x640xf32, #tpu.memory_space<vmem>>, vector<1x640xf32>
    tpu.vector_store %arg7[%c0_21, %c0_22], %56 {strides = array<i32>} : memref<1x640xf32, #tpu.memory_space<vmem>>, vector<1x640xf32>,
    %c0_23 = arith.constant 0 : index
    %c0_24 = arith.constant 0 : index
    %67 = vector.load %arg6[%c0_23, %c0_24] : memref<1x640xf32, #tpu.memory_space<vmem>>, vector<1x640xf32>
    tpu.vector_store %arg6[%c0_23, %c0_24], %65 {strides = array<i32>} : memref<1x640xf32, #tpu.memory_space<vmem>>, vector<1x640xf32>,
    return
  }
  func.func @transform_0(%arg0: i32) -> (i32, i32) {
    %c0_i32 = arith.constant 0 : i32
    %c0_i32_0 = arith.constant 0 : i32
    return %c0_i32, %arg0 : i32, i32
  }
  func.func @transform_1(%arg0: i32) -> (i32, i32) {
    %c0_i32 = arith.constant 0 : i32
    %c0_i32_0 = arith.constant 0 : i32
    %c0_i32_1 = arith.constant 0 : i32
    return %c0_i32, %c0_i32_0 : i32, i32
  }
  func.func @transform_2(%arg0: i32) -> (i32, i32) {
    %c0_i32 = arith.constant 0 : i32
    %c0_i32_0 = arith.constant 0 : i32
    %c0_i32_1 = arith.constant 0 : i32
    return %c0_i32, %c0_i32_0 : i32, i32
  }
  func.func @transform_3(%arg0: i32) -> (i32, i32) {
    %c0_i32 = arith.constant 0 : i32
    %c0_i32_0 = arith.constant 0 : i32
    %c0_i32_1 = arith.constant 0 : i32
    return %c0_i32, %c0_i32_0 : i32, i32
  }
  func.func @transform_4(%arg0: i32) -> (i32, i32) {
    %c0_i32 = arith.constant 0 : i32
    %c0_i32_0 = arith.constant 0 : i32
    %c0_i32_1 = arith.constant 0 : i32
    return %c0_i32, %c0_i32_0 : i32, i32
  }
  func.func @transform_5(%arg0: i32) -> (i32, i32) {
    %c0_i32 = arith.constant 0 : i32
    %c0_i32_0 = arith.constant 0 : i32
    return %c0_i32, %arg0 : i32, i32
  }
  func.func @transform_6(%arg0: i32) -> (i32, i32) {
    %c0_i32 = arith.constant 0 : i32
    %c0_i32_0 = arith.constant 0 : i32
    return %c0_i32, %arg0 : i32, i32
  }
}

</mosaic_0001>

<bundles_post_ra>
// kernel: tpu_custom_call.1
= control target key start
LH: loop header
LB: loop body
LE: loop exit
PB: predicated region body
PF: predicated region fallthrough
CT: control target
= control target key end

     0   :  { %12 = vsyncpa [#allocation3], 0  ;;  %vm43_vm0 = vcmask 64512   ;;  %v1130_v5 = vmov 0.0   ;;  %s1369_s0 = inlined_call_operand.vmem [shape: f32[8,600], index: 0, kind: input, shape index: {}]   ;;  %s1370_s1 = inlined_call_operand.vmem [shape: f32[16,8], index: 1, kind: input, shape index: {}]   ;;  %s1371_s2 = inlined_call_operand.vmem [shape: f32[16,3], index: 2, kind: input, shape index: {}]   ;;  %s1372_s3 = inlined_call_operand.vmem [shape: f32[1,16], index: 3, kind: input, shape index: {}]   ;;  %s1373_s4 = inlined_call_operand.vmem [shape: f32[1,3], index: 4, kind: input, shape index: {}]   ;;  %s1374_s5 = inlined_call_operand.hbm [shape: f32[1,600], index: 5, kind: output, shape index: {0}]   ;;  %s1375_s6 = inlined_call_operand.hbm [shape: f32[1,600], index: 6, kind: output, shape index: {1}]  }
   0x1   :  { %v25_v0 = vld [vmem:[%s1369_s0 + $0x8] sm:$0xff]  ;;  %v27_v1 = vld [vmem:[%s1369_s0 + $0x18] sm:$0xff]  ;;  %v24_v2 = vld [vmem:[%s1369_s0] sm:$0xff]  ;;  %114 = vmatprep.mubr.f32.mxu0 %v1130_v5  ;;  %191 = vmatprep.mubr.f32.mxu1 %v1130_v5 }
   0x2   :  { %80 = vmatprep.subr.mxu0 %v25_v0  ;;  %157 = vmatprep.subr.mxu1 %v27_v1  ;;  %v26_v3 = vld [vmem:[%s1369_s0 + $0x10] sm:$0xff]  ;;  %v29_v4 = vld [vmem:[%s1370_s1] sm:$0xff] }
   0x3   :  { %81 = vmatpush1.msra.mxu0 %v24_v2  ;;  %158 = vmatpush1.msra.mxu1 %v26_v3  ;;  %v28_v6 = vld [vmem:[%s1369_s0 + $0x20] sm:$0xff] }
   0x4   :  { %13 = vsyncpa [#allocation5], 0  ;;  %963 = vmatmul.mubr.msk.f32.vlgmr.msra.gmra.mxu0 %vm43_vm0, %v29_v4  ;;  %965 = vmatmul.mubr.msk.f32.vlgmr.msra.gmra.mxu1 %vm43_vm0, %v29_v4  ;;  %v31_v7 = vld [vmem:[%s1371_s2] sm:$0xff]  ;;  %v30_v8 = vld [vmem:[%s1370_s1 + $0x8] sm:$0xff]  ;;  %v1131_v9 = vmov 0   ;;  %v1132_v11 = vmov 1  }
   0x5   :  { %120 = vmatprep.mubr.f32.mxu0 %v1130_v5  ;;  %197 = vmatprep.mubr.f32.mxu1 %v1130_v5  ;;  %v32_v10 = vld [vmem:[%s1371_s2 + $0x8] sm:$0xff]  ;;  %v1133_v12 = vmov 2   ;;  %v526_v13 = vld [vmem:[%s1373_s4] sm:$0x1]  ;;  %vm537_vm1 = vcmask 130048   ;;  %vm1134_vm2 = vmmov 0  }
   0x6   :  { %988 = vmatprep.subr.mxu0 %v28_v6  ;;  %1008 = vset.pattern.permute.xlu0 %v1131_v9 }
   0x7   :  { %989 = vmatpush3.msra.mxu0 %v28_v6  ;;  %35 = vperm.xlu0 %1008, %v31_v7  }
   0x8   :  { %964 = vmatmul.mubr.msk.f32.gmra.mxu0 %vm43_vm0, %v30_v8  ;;  %966 = vmatmul.mubr.msk.f32.gmra.mxu1 %vm43_vm0, %v30_v8 }
   0x9   :  { %990 = vmatprep.mubr.msk.f32.mxu0 %vm43_vm0, %v29_v4  ;;  %1009 = vset.pattern.permute.xlu1 %v1132_v11 }
   0xa   :  { %405 = vperm.xlu1 %1009, %v32_v10   ;;  %605 = vmatprep.mubr.f32.mxu1 %v1130_v5 }
   0xb   :  { %40 = vperm.xlu0 %1008, %v32_v10  }
   0xc   :  { %991 = vmatmul.mubr.msk.f32.vlgmr.msra.gmra.mxu0 %vm43_vm0, %v30_v8 }
   0xd   :  { %676 = vmatprep.mubr.f32.mxu0 %v1130_v5 }
   0xe   :  { %401 = vperm.xlu1 %1009, %v31_v7  }
   0xf   :  { %1010 = vset.pattern.permute.xlu0 %v1133_v12 }
  0x10   :  { %423 = vperm.xlu0 %1010, %v32_v10  }
  0x12   :  { %1011 = vset.pattern.permute.xlu1 %v1133_v12 }
  0x13   :  { %419 = vperm.xlu1 %1011, %v31_v7  }
  0x14   :  { %1013 = vset.pattern.permute.xlu0 %v1132_v11 }
  0x15   :  { %784 = vperm.xlu0 %1013, %v526_v13  }
  0x17   :  { %1012 = vset.pattern.permute.xlu1 %v1131_v9 }
  0x18   :  { %530 = vperm.xlu1 %1012, %v526_v13  }
  0x19   :  { %1015 = vset.pattern.permute.xlu0 %v1133_v12 }
  0x1c   :  { %1014 = vset.pattern.permute.xlu1 %v1133_v12 }
  0x1d   :  { %797 = vperm.xlu1 %1014, %v526_v13  }
  0x82   :  { %v36_v14 = vpop.permute.xlu0 %35 }
  0x86   :  { %v41_v19 = vpop.permute.xlu0 %40 }
  0xc4   :  { %v116_v15 = vpop.f32.mrf.mxu0  ;;  %v193_v16 = vpop.f32.mrf.mxu1 }
  0xc5   :  { %v117_v22 = vadd.f32 %v116_v15, %v36_v14  ;;  %v194_v23 = vadd.f32 %v193_v16, %v36_v14 }
  0xc6   :  { %v118_v17 = vpop.f32.mrf.mxu0  ;;  %v195_v18 = vpop.f32.mrf.mxu1 }
  0xc7   :  { %v119_v26 = vadd.f32 %v118_v17, %v36_v14  ;;  %v196_v27 = vadd.f32 %v195_v18, %v36_v14 }
  0xc8   :  { %v122_v20 = vpop.f32.mrf.mxu0  ;;  %v199_v21 = vpop.f32.mrf.mxu1 }
  0xc9   :  { %v123_v24 = vadd.f32 %v122_v20, %v41_v19  ;;  %v200_v25 = vadd.f32 %v199_v21, %v41_v19 }
  0xca   :  { %v124_v28 = vpop.f32.mrf.mxu0  ;;  %v201_v29 = vpop.f32.mrf.mxu1 }
  0xcb   :  { %v279_v30 = vadd.f32 %v123_v24, %v117_v22  ;;  %v293_v31 = vadd.f32 %v200_v25, %v194_v23  ;;  %v125_v32 = vadd.f32 %v124_v28, %v41_v19  ;;  %v202_v33 = vadd.f32 %v201_v29, %v41_v19 }
  0xcc   :  { %v992_v34 = vpop.f32.mrf.mxu0 }
  0xcd   :  { %v280_v35 = vrot.slane %v279_v30, 4  ;;  %v294_v36 = vrot.slane %v293_v31, 4  ;;  %v286_v37 = vadd.f32 %v125_v32, %v119_v26  ;;  %v300_v38 = vadd.f32 %v202_v33, %v196_v27 }
  0xce   :  { %v270_v39 = vpop.f32.mrf.mxu0  ;;  %v276_v44 = vadd.f32 %v992_v34, %v41_v19 }
  0xcf   :  { %v281_v40 = vadd.f32 %v280_v35, %v279_v30  ;;  %v295_v41 = vadd.f32 %v294_v36, %v293_v31  ;;  %v287_v42 = vrot.slane %v286_v37, 4  ;;  %v301_v43 = vrot.slane %v300_v38, 4 }
  0xd0   :  { %v271_v45 = vadd.f32 %v270_v39, %v36_v14 }
  0xd1   :  { %v282_v46 = vrot.slane %v281_v40, 2  ;;  %v296_v47 = vrot.slane %v295_v41, 2  ;;  %v288_v48 = vadd.f32 %v287_v42, %v286_v37  ;;  %v302_v49 = vadd.f32 %v301_v43, %v300_v38 }
  0xd2   :  { %v307_v50 = vadd.f32 %v276_v44, %v271_v45 }
  0xd3   :  { %v283_v51 = vadd.f32 %v282_v46, %v281_v40  ;;  %v297_v52 = vadd.f32 %v296_v47, %v295_v41  ;;  %v289_v53 = vrot.slane %v288_v48, 2  ;;  %v303_v54 = vrot.slane %v302_v49, 2 }
  0xd4   :  { %v308_v55 = vrot.slane %v307_v50, 4 }
  0xd5   :  { %v284_v56 = vrot.slane %v283_v51, 1  ;;  %v298_v57 = vrot.slane %v297_v52, 1  ;;  %v290_v58 = vadd.f32 %v289_v53, %v288_v48  ;;  %v304_v59 = vadd.f32 %v303_v54, %v302_v49 }
  0xd6   :  { %v309_v60 = vadd.f32 %v308_v55, %v307_v50 }
  0xd7   :  { %v285_v61 = vadd.f32 %v284_v56, %v283_v51  ;;  %v299_v62 = vadd.f32 %v298_v57, %v297_v52  ;;  %v291_v63 = vrot.slane %v290_v58, 1  ;;  %v305_v0 = vrot.slane %v304_v59, 1 }
  0xd8   :  { %v310_v1 = vrot.slane %v309_v60, 2 }
  0xd9   :  { %v315_v2 = vmul.f32 0.0625, %v285_v61  ;;  %v317_v3 = vmul.f32 0.0625, %v299_v62  ;;  %v292_v4 = vadd.f32 %v291_v63, %v290_v58  ;;  %v306_v6 = vadd.f32 %v305_v0, %v304_v59 }
  0xda   :  { %v311_v7 = vadd.f32 %v310_v1, %v309_v60 }
  0xdb   :  { %v1215_v8 = vsub.f32 %v117_v22, %v315_v2  ;;  %v1217_v9 = vsub.f32 %v123_v24, %v315_v2  ;;  %v1219_v10 = vsub.f32 %v194_v23, %v317_v3  ;;  %v1221_v11 = vsub.f32 %v200_v25, %v317_v3 }
  0xdc   :  { %v316_v12 = vmul.f32 0.0625, %v292_v4  ;;  %v318_v13 = vmul.f32 0.0625, %v306_v6  ;;  %v312_v14 = vrot.slane %v311_v7, 1 }
  0xdd   :  { %v330_v15 = vmul.f32 %v1215_v8, %v1215_v8  ;;  %v335_v16 = vmul.f32 %v1217_v9, %v1217_v9  ;;  %v332_v17 = vmul.f32 %v1219_v10, %v1219_v10  ;;  %v337_v18 = vmul.f32 %v1221_v11, %v1221_v11 }
  0xde   :  { %v1231_v19 = vsub.f32 %v119_v26, %v316_v12  ;;  %v1233_v20 = vsub.f32 %v125_v32, %v316_v12  ;;  %v1235_v21 = vsub.f32 %v196_v27, %v318_v13  ;;  %v1237_v22 = vsub.f32 %v202_v33, %v318_v13 }
  0xdf   :  { %v340_v23 = vadd.f32 %v335_v16, %v330_v15  ;;  %v354_v24 = vadd.f32 %v337_v18, %v332_v17  ;;  %v313_v25 = vadd.f32 %v312_v14, %v311_v7  ;;  %v406_v17 = vpop.permute.xlu1 %405 }
  0xe0   :  { %v331_v28 = vmul.f32 %v1231_v19, %v1231_v19  ;;  %v336_v29 = vmul.f32 %v1233_v20, %v1233_v20  ;;  %v333_v30 = vmul.f32 %v1235_v21, %v1235_v21  ;;  %v338_v26 = vmul.f32 %v1237_v22, %v1237_v22 }
  0xe1   :  { %v341_v31 = vrot.slane %v340_v23, 4  ;;  %v355_v27 = vrot.slane %v354_v24, 4  ;;  %v319_v32 = vmul.f32 0.0625, %v313_v25 }
  0xe2   :  { %v347_v33 = vadd.f32 %v336_v29, %v331_v28  ;;  %v361_v34 = vadd.f32 %v338_v26, %v333_v30 }
  0xe3   :  { %v342_v35 = vadd.f32 %v341_v31, %v340_v23  ;;  %v356_v36 = vadd.f32 %v355_v27, %v354_v24  ;;  %v1247_v37 = vsub.f32 %v271_v45, %v319_v32  ;;  %v1249_v38 = vsub.f32 %v276_v44, %v319_v32  ;;  %v402_v24 = vpop.permute.xlu1 %401  ;;  %v424_v32 = vpop.permute.xlu0 %423 }
  0xe4   :  { %v348_v39 = vrot.slane %v347_v33, 4  ;;  %v362_v40 = vrot.slane %v361_v34, 4 }
  0xe5   :  { %v343_v41 = vrot.slane %v342_v35, 2  ;;  %v357_v42 = vrot.slane %v356_v36, 2  ;;  %v334_v43 = vmul.f32 %v1247_v37, %v1247_v37  ;;  %v339_v46 = vmul.f32 %v1249_v38, %v1249_v38 }
  0xe6   :  { %v349_v47 = vadd.f32 %v348_v39, %v347_v33  ;;  %v363_v48 = vadd.f32 %v362_v40, %v361_v34 }
  0xe7   :  { %v344_v49 = vadd.f32 %v343_v41, %v342_v35  ;;  %v358_v50 = vadd.f32 %v357_v42, %v356_v36  ;;  %v368_v51 = vadd.f32 %v339_v46, %v334_v43  ;;  %v420_v27 = vpop.permute.xlu1 %419 }
  0xe8   :  { %v350_v52 = vrot.slane %v349_v47, 2  ;;  %v364_v45 = vrot.slane %v363_v48, 2 }
  0xe9   :  { %v345_v53 = vrot.slane %v344_v49, 1  ;;  %v359_v44 = vrot.slane %v358_v50, 1  ;;  %v369_v54 = vrot.slane %v368_v51, 4 }
  0xea   :  { %v351_v55 = vadd.f32 %v350_v52, %v349_v47  ;;  %v365_v56 = vadd.f32 %v364_v45, %v363_v48 }
  0xeb   :  { %v346_v57 = vadd.f32 %v345_v53, %v344_v49  ;;  %v360_v58 = vadd.f32 %v359_v44, %v358_v50  ;;  %v370_v59 = vadd.f32 %v369_v54, %v368_v51 }
  0xec   :  { %v352_v60 = vrot.slane %v351_v55, 1  ;;  %v366_v61 = vrot.slane %v365_v56, 1 }
  0xed   :  { %v375_v62 = vmul.f32 0.0625, %v346_v57  ;;  %v377_v63 = vmul.f32 0.0625, %v360_v58  ;;  %v371_v0 = vrot.slane %v370_v59, 2 }
  0xee   :  { %v353_v1 = vadd.f32 %v352_v60, %v351_v55  ;;  %v367_v2 = vadd.f32 %v366_v61, %v365_v56 }
  0xef   :  { %v380_v3 = vadd.f32 1e-05, %v375_v62  ;;  %v382_v4 = vadd.f32 1e-05, %v377_v63  ;;  %v372_v6 = vadd.f32 %v371_v0, %v370_v59 }
  0xf0   :  { %v376_v7 = vmul.f32 0.0625, %v353_v1  ;;  %v378_v12 = vmul.f32 0.0625, %v367_v2 }
  0xf1   :  { %1016 = vrsqrt.f32 %v380_v3  ;;  %v373_v13 = vrot.slane %v372_v6, 1 }
  0xf2   :  { %1018 = vrsqrt.f32 %v382_v4  ;;  %v381_v14 = vadd.f32 1e-05, %v376_v7  ;;  %v383_v15 = vadd.f32 1e-05, %v378_v12 }
  0xf3   :  { %v374_v16 = vadd.f32 %v373_v13, %v372_v6 }
  0xf4   :  { %1020 = vrsqrt.f32 %v381_v14 }
  0xf5   :  { %1022 = vrsqrt.f32 %v383_v15  ;;  %v379_v18 = vmul.f32 0.0625, %v374_v16 }
  0xf7   :  { %v384_v23 = vadd.f32 1e-05, %v379_v18 }
  0xf9   :  { %1024 = vrsqrt.f32 %v384_v23 }
  0xfe   :  { %v1017_v25 = vpop.eup %1016 }
  0xff   :  { %v1019_v28 = vpop.eup %1018  ;;  %v390_v29 = vmul.f32 %v1017_v25, %v1215_v8  ;;  %v395_v30 = vmul.f32 %v1017_v25, %v1217_v9 }
 0x100   :  { %v392_v26 = vmul.f32 %v1019_v28, %v1219_v10  ;;  %v397_v31 = vmul.f32 %v1019_v28, %v1221_v11 }
 0x101   :  { %v1021_v33 = vpop.eup %1020  ;;  %v413_v34 = vmul.f32 %v406_v17, %v395_v30  ;;  %v408_v35 = vmul.f32 %v402_v24, %v390_v29 }
 0x102   :  { %v1023_v36 = vpop.eup %1022  ;;  %v391_v39 = vmul.f32 %v1021_v33, %v1231_v19  ;;  %v396_v40 = vmul.f32 %v1021_v33, %v1233_v20  ;;  %v415_v41 = vmul.f32 %v406_v17, %v397_v31  ;;  %v410_v42 = vmul.f32 %v402_v24, %v392_v26 }
 0x103   :  { %v393_v8 = vmul.f32 %v1023_v36, %v1235_v21  ;;  %v398_v9 = vmul.f32 %v1023_v36, %v1237_v22  ;;  %v1263_v43 = vadd.f32 %v420_v27, %v408_v35  ;;  %v1265_v10 = vadd.f32 %v424_v32, %v413_v34 }
 0x104   :  { %v414_v11 = vmul.f32 %v406_v17, %v396_v40  ;;  %v409_v46 = vmul.f32 %v402_v24, %v391_v39  ;;  %v1267_v47 = vadd.f32 %v420_v27, %v410_v42  ;;  %v1269_v48 = vadd.f32 %v424_v32, %v415_v41 }
 0x105   :  { %v416_v49 = vmul.f32 %v406_v17, %v398_v9  ;;  %v411_v19 = vmul.f32 %v402_v24, %v393_v8  ;;  %v436_v20 = vmul.f32 %v1263_v43, %v1263_v43  ;;  %v441_v21 = vmul.f32 %v1265_v10, %v1265_v10 }
 0x106   :  { %v1025_v50 = vpop.eup %1024  ;;  %v1275_v22 = vadd.f32 %v420_v27, %v409_v46  ;;  %v438_v51 = vmul.f32 %v1267_v47, %v1267_v47  ;;  %v1279_v52 = vadd.f32 %v424_v32, %v414_v11  ;;  %v443_v45 = vmul.f32 %v1269_v48, %v1269_v48 }
 0x107   :  { %v394_v53 = vmul.f32 %v1025_v50, %v1247_v37  ;;  %v399_v44 = vmul.f32 %v1025_v50, %v1249_v38  ;;  %v1285_v54 = vadd.f32 %v420_v27, %v411_v19  ;;  %v446_v55 = vmul.f32 %v436_v20, %v1263_v43 }
 0x108   :  { %v448_v56 = vmul.f32 %v438_v51, %v1267_v47  ;;  %v1289_v57 = vadd.f32 %v424_v32, %v416_v49  ;;  %v451_v58 = vmul.f32 %v441_v21, %v1265_v10  ;;  %v453_v59 = vmul.f32 %v443_v45, %v1269_v48 }
 0x109   :  { %v417_v60 = vmul.f32 %v406_v17, %v399_v44  ;;  %v412_v61 = vmul.f32 %v402_v24, %v394_v53  ;;  %v442_v62 = vmul.f32 %v1279_v52, %v1279_v52  ;;  %v437_v37 = vmul.f32 %v1275_v22, %v1275_v22 }
 0x10a   :  { %v444_v38 = vmul.f32 %v1289_v57, %v1289_v57  ;;  %v461_v63 = vmul.f32 0.044715, %v451_v58  ;;  %v463_v0 = vmul.f32 0.044715, %v453_v59  ;;  %v439_v1 = vmul.f32 %v1285_v54, %v1285_v54 }
 0x10b   :  { %v1301_v2 = vadd.f32 %v420_v27, %v412_v61  ;;  %v1303_v3 = vadd.f32 %v424_v32, %v417_v60  ;;  %v452_v4 = vmul.f32 %v442_v62, %v1279_v52  ;;  %v447_v6 = vmul.f32 %v437_v37, %v1275_v22 }
 0x10c   :  { %v454_v7 = vmul.f32 %v444_v38, %v1289_v57  ;;  %v471_v12 = vadd.f32 %v461_v63, %v1265_v10  ;;  %v473_v13 = vadd.f32 %v463_v0, %v1269_v48  ;;  %v449_v14 = vmul.f32 %v439_v1, %v1285_v54 }
 0x10d   :  { %v440_v15 = vmul.f32 %v1301_v2, %v1301_v2  ;;  %v445_v16 = vmul.f32 %v1303_v3, %v1303_v3  ;;  %v462_v17 = vmul.f32 0.044715, %v452_v4  ;;  %v457_v18 = vmul.f32 0.044715, %v447_v6 }
 0x10e   :  { %v464_v23 = vmul.f32 0.044715, %v454_v7  ;;  %v481_v24 = vmul.f32 0.7978846, %v471_v12  ;;  %v483_v25 = vmul.f32 0.7978846, %v473_v13 }
 0x10f   :  { %v450_v28 = vmul.f32 %v440_v15, %v1301_v2  ;;  %v455_v29 = vmul.f32 %v445_v16, %v1303_v3  ;;  %v472_v30 = vadd.f32 %v462_v17, %v1279_v52  ;;  %v467_v26 = vadd.f32 %v457_v18, %v1275_v22 }
 0x110   :  { %v474_v31 = vadd.f32 %v464_v23, %v1289_v57  ;;  %1026 = vtanh.f32 %v481_v24  ;;  %v459_v27 = vmul.f32 0.044715, %v449_v14  ;;  %v456_v32 = vmul.f32 0.044715, %v446_v55 }
 0x111   :  { %v482_v33 = vmul.f32 0.7978846, %v472_v30  ;;  %1028 = vtanh.f32 %v483_v25  ;;  %v477_v34 = vmul.f32 0.7978846, %v467_v26  ;;  %v458_v35 = vmul.f32 0.044715, %v448_v56 }
 0x112   :  { %v484_v36 = vmul.f32 0.7978846, %v474_v31  ;;  %v469_v39 = vadd.f32 %v459_v27, %v1285_v54  ;;  %v466_v40 = vadd.f32 %v456_v32, %v1263_v43  ;;  %v465_v41 = vmul.f32 0.044715, %v455_v29 }
 0x113   :  { %1030 = vtanh.f32 %v482_v33  ;;  %v468_v42 = vadd.f32 %v458_v35, %v1267_v47  ;;  %v460_v8 = vmul.f32 0.044715, %v450_v28 }
 0x114   :  { %1032 = vtanh.f32 %v484_v36  ;;  %v479_v9 = vmul.f32 0.7978846, %v469_v39  ;;  %v476_v11 = vmul.f32 0.7978846, %v466_v40  ;;  %v475_v46 = vadd.f32 %v465_v41, %v1303_v3 }
 0x115   :  { %1034 = vtanh.f32 %v477_v34  ;;  %v478_v49 = vmul.f32 0.7978846, %v468_v42  ;;  %v470_v19 = vadd.f32 %v460_v8, %v1301_v2 }
 0x116   :  { %1036 = vtanh.f32 %v479_v9  ;;  %v485_v20 = vmul.f32 0.7978846, %v475_v46 }
 0x117   :  { %1038 = vtanh.f32 %v476_v11  ;;  %v480_v21 = vmul.f32 0.7978846, %v470_v19 }
 0x118   :  { %1040 = vtanh.f32 %v478_v49 }
 0x119   :  { %1042 = vtanh.f32 %v485_v20 }
 0x11a   :  { %1044 = vtanh.f32 %v480_v21 }
 0x11d   :  { %v1027_v50 = vpop.eup %1026 }
 0x11e   :  { %v1029_v51 = vpop.eup %1028  ;;  %v501_v45 = vadd.f32 1.0, %v1027_v50 }
 0x11f   :  { %v503_v53 = vadd.f32 1.0, %v1029_v51 }
 0x120   :  { %v1031_v44 = vpop.eup %1030  ;;  %v511_v60 = vmul.f32 0.5, %v501_v45 }
 0x121   :  { %v1033_v55 = vpop.eup %1032  ;;  %v502_v56 = vadd.f32 1.0, %v1031_v44  ;;  %v513_v37 = vmul.f32 0.5, %v503_v53 }
 0x122   :  { %v1035_v58 = vpop.eup %1034  ;;  %v504_v59 = vadd.f32 1.0, %v1033_v55  ;;  %v521_v15 = vmul.f32 %v511_v60, %v1265_v10 }
 0x123   :  { %v1037_v61 = vpop.eup %1036  ;;  %v512_v62 = vmul.f32 0.5, %v502_v56  ;;  %v497_v38 = vadd.f32 1.0, %v1035_v58  ;;  %v523_v23 = vmul.f32 %v513_v37, %v1269_v48  ;;  %v527_v48 = vld [vmem:[%s1372_s3] sm:$0x1]  ;;  %s1136_s3 = smov [#allocation4]  }
 0x124   :  { %v1039_v63 = vpop.eup %1038  ;;  %v514_v0 = vmul.f32 0.5, %v504_v59  ;;  %v499_v1 = vadd.f32 1.0, %v1037_v61  ;;  %v1135_v59 = vmov 1966171168   ;;  %v785_v61 = vpop.permute.xlu0 %784  ;;  %s951_s15 = sshll.u32 %s1136_s3, 4  ;;  %s952_s15 = int_to_ptr.vmem [resolvable:$true] %s951_s15 }
 0x125   :  { %v1041_v4 = vpop.eup %1040  ;;  %v522_v6 = vmul.f32 %v512_v62, %v1279_v52  ;;  %v507_v7 = vmul.f32 0.5, %v497_v38  ;;  %v496_v12 = vadd.f32 1.0, %v1039_v63  ;;  %v847_v60 = vunpack.c.l.s4 %v1135_v59  ;;  %s1086_s16 = scalar_lea.vmem %s952_s15, 80  ;;  %s1090_s17 = scalar_lea.vmem %s952_s15, 96 }
 0x126   :  { %v1043_v13 = vpop.eup %1042  ;;  %v524_v14 = vmul.f32 %v514_v0, %v1289_v57  ;;  %v509_v16 = vmul.f32 0.5, %v499_v1  ;;  %v498_v17 = vadd.f32 1.0, %v1041_v4  ;;  %p1087_p0 = scmp.ne.s32.totalorder %s952_s15, %s1086_s16  ;;  %p1091_p1 = scmp.lt.s32.totalorder %s952_s15, %s952_s15 }
 0x127   :  { %v1045_v18 = vpop.eup %1044  ;;  %569 = vmatprep.subr.mxu1 %v522_v6  ;;  %v517_v24 = vmul.f32 %v507_v7, %v1275_v22  ;;  %v506_v25 = vmul.f32 0.5, %v496_v12  ;;  %v505_v28 = vadd.f32 1.0, %v1043_v13  ;;  %v848_v37 = vunpack.c.0.s8 %v847_v60  ;;  %p1092_p2 = scmp.lt.s32.totalorder %s1090_s17, %s1086_s16 }
 0x128   :  { %640 = vmatprep.subr.mxu0 %v524_v14  ;;  %570 = vmatpush1.msra.mxu1 %v521_v15  ;;  %v519_v52 = vmul.f32 %v509_v16, %v1285_v54  ;;  %v508_v29 = vmul.f32 0.5, %v498_v17  ;;  %v500_v30 = vadd.f32 1.0, %v1045_v18 }
 0x129   :  { %641 = vmatpush1.msra.mxu0 %v523_v23  ;;  %571 = vmatprep.subr.mxu1 %v517_v24  ;;  %v516_v10 = vmul.f32 %v506_v25, %v1263_v43  ;;  %v515_v57 = vmul.f32 0.5, %v505_v28  ;;  %p1093_p3 = por %p1092_p2, %p1091_p1 }
 0x12a   :  { %642 = vmatprep.subr.mxu0 %v519_v52  ;;  %v518_v26 = vmul.f32 %v508_v29, %v1267_v47  ;;  %v510_v22 = vmul.f32 0.5, %v500_v30  ;;  %v533_v47 = vlaneseq }
 0x12b   :  { %572 = vmatpush1.msra.mxu1 %v516_v10  ;;  %v525_v31 = vmul.f32 %v515_v57, %v1303_v3  ;;  %v531_v3 = vpop.permute.xlu1 %530  ;;  %p1094_p4 = pnand %p1093_p3, %p1087_p0 }
 0x12c   :  { %643 = vmatpush1.msra.mxu0 %v518_v26  ;;  %993 = vmatprep.subr.mxu1 %v1130_v5  ;;  %v520_v43 = vmul.f32 %v510_v22, %v1301_v2  ;;  %v534_v54 = vshrl.u32 %v533_v47, 7  ;;  %vm1350_vm3 = vcmp.lt.s32.totalorder %v533_v47, 640 }
 0x12d   :  { %969 = vmatmul.mubr.msk.f32.vlgmr.msra.gmra.mxu1 %vm537_vm1, %v527_v48  ;;  %970 = vmatmul.mubr.msk.f32.vlgmr.msra.gmra.mxu0 %vm537_vm1, %v527_v48 }
 0x12e   :  { %994 = vmatpush3.msra.mxu1 %v525_v31  ;;  %997 = vmatprep.mubr.msk.f32.mxu1 %vm1134_vm2, %v1130_v5  ;;  %v535_v27 = vsub.s32 0, %v534_v54  ;;  %v1342_v4 = vsub.s32 %v848_v37, %v534_v54 }
 0x12f   :  { %995 = vmatprep.subr.mxu1 %v1130_v5  ;;  %v798_v62 = vpop.permute.xlu1 %797 }
 0x130   :  { %996 = vmatpush3.msra.mxu1 %v520_v43  ;;  %v536_v32 = vrot.slane %v531_v3, %v535_v27  ;;  %v790_v38 = vrot.slane %v785_v61, %v535_v27  ;;  %v803_v63 = vrot.slane %v798_v62, %v535_v27 }
 0x131   :  { %998 = vmatmul.mubr.msk.f32.vlgmr.msra.gmra.mxu1 %vm537_vm1, %v527_v48 }
 0x1ed   :  { %v607_v33 = vpop.f32.mrf.mxu1  ;;  %v678_v34 = vpop.f32.mrf.mxu0 }
 0x1ee   :  { %v608_v35 = vadd.f32 %v607_v33, %v536_v32  ;;  %v679_v36 = vadd.f32 %v678_v34, %v536_v32 }
 0x1ef   :  { %v609_v39 = vpop.f32.mrf.mxu1  ;;  %v680_v40 = vpop.f32.mrf.mxu0 }
 0x1f0   :  { %v972_v2 = vmul.f32 -1.442695, %v608_v35  ;;  %v974_v41 = vmul.f32 -1.442695, %v679_v36  ;;  %v610_v42 = vadd.f32 %v609_v39, %v536_v32  ;;  %v681_v8 = vadd.f32 %v680_v40, %v536_v32 }
 0x1f1   :  { %v749_v9 = vpop.f32.mrf.mxu1 }
 0x1f2   :  { %1046 = vpow2.f32 %v972_v2  ;;  %v973_v5 = vmul.f32 -1.442695, %v610_v42  ;;  %v975_v11 = vmul.f32 -1.442695, %v681_v8  ;;  %v750_v46 = vadd.f32 %v749_v9, %v536_v32 }
 0x1f3   :  { %1048 = vpow2.f32 %v974_v41  ;;  %v999_v49 = vpop.f32.mrf.mxu1 }
 0x1f4   :  { %1050 = vpow2.f32 %v973_v5  ;;  %v976_v19 = vmul.f32 -1.442695, %v750_v46 }
 0x1f5   :  { %1052 = vpow2.f32 %v975_v11 }
 0x1f6   :  { %1054 = vpow2.f32 %v976_v19 }
 0x1ff   :  { %v1047_v20 = vpop.eup %1046 }
 0x200   :  { %v1049_v21 = vpop.eup %1048  ;;  %v768_v50 = vadd.f32 1.0, %v1047_v20 }
 0x201   :  { %v1051_v51 = vpop.eup %1050  ;;  %v770_v45 = vadd.f32 1.0, %v1049_v21 }
 0x202   :  { %v1053_v53 = vpop.eup %1052  ;;  %1056 = vrcp.f32 %v768_v50  ;;  %v769_v44 = vadd.f32 1.0, %v1051_v51 }
 0x203   :  { %v1055_v55 = vpop.eup %1054  ;;  %1058 = vrcp.f32 %v770_v45  ;;  %v771_v56 = vadd.f32 1.0, %v1053_v53 }
 0x204   :  { %1060 = vrcp.f32 %v769_v44  ;;  %v772_v58 = vadd.f32 1.0, %v1055_v55 }
 0x205   :  { %1062 = vrcp.f32 %v771_v56 }
 0x206   :  { %1064 = vrcp.f32 %v772_v58 }
 0x20f   :  { %v1057_v0 = vpop.eup %1056 }
 0x210   :  { %v1059_v1 = vpop.eup %1058  ;;  %v791_v6 = vsub.f32 %v1057_v0, %v790_v38 }
 0x211   :  { %v1061_v7 = vpop.eup %1060  ;;  %v793_v12 = vsub.f32 %v1059_v1, %v790_v38 }
 0x212   :  { %v1063_v13 = vpop.eup %1062  ;;  %v792_v14 = vsub.f32 %v1061_v7, %v790_v38  ;;  %v804_v15 = vmul.f32 %v803_v63, %v791_v6  ;;  %v844_v16 = vcombine.low %v1057_v0, %v1061_v7 }
 0x213   :  { %v1065_v17 = vpop.eup %1064  ;;  %v794_v18 = vsub.f32 %v1063_v13, %v790_v38  ;;  %v806_v23 = vmul.f32 %v803_v63, %v793_v12  ;;  %v845_v24 = vcombine.low %v1059_v1, %v1063_v13 }
 0x214   :  { %v795_v25 = vsub.f32 %v1065_v17, %v790_v38  ;;  %v805_v28 = vmul.f32 %v803_v63, %v792_v14  ;;  %v977_v52 = vmul.f32 -1.442695, %v804_v15  ;;  %v852_v29 = vrot.slane %v844_v16, %v1342_v4 }
 0x215   :  { %v807_v30 = vmul.f32 %v803_v63, %v794_v18  ;;  %v979_v10 = vmul.f32 -1.442695, %v806_v23  ;;  %v859_v57 = vrot.slane %v845_v24, %v1342_v4  ;;  %v866_v26 = vrot.slane %v1065_v17, %v1342_v4 }
 0x216   :  { %v808_v48 = vmul.f32 %v803_v63, %v795_v25  ;;  %1066 = vpow2.f32 %v977_v52  ;;  %v978_v22 = vmul.f32 -1.442695, %v805_v28 }
 0x217   :  { %1068 = vpow2.f32 %v979_v10  ;;  %v980_v31 = vmul.f32 -1.442695, %v807_v30  ;;  %v867_v43 = vcombine.low %v852_v29, %v859_v57  ;;  %v881_v3 = vrot.slane %v866_v26, %v1342_v4 }
 0x218   :  { %1070 = vpow2.f32 %v978_v22  ;;  %v981_v54 = vmul.f32 -1.442695, %v808_v48 }
 0x219   :  { %1072 = vpow2.f32 %v980_v31  ;;  %v874_v27 = vrot.slane %v867_v43, %v1342_v4 }
 0x21a   :  { %1074 = vpow2.f32 %v981_v54 }
 0x21b   :  { %v882_v33 = vcombine.low %v874_v27, %v881_v3 }
 0x21d   :  { %888 = vst.msk [vmem:[#allocation4] sm:$0x1f] %vm1350_vm3, %v882_v33 }
 0x21e   :  { %1097 = shalt.err (!%p1094_p4)
}
 0x21f   :  { %954 = dma.vmem_to_hbm [thread:$0]  %s952_s15, 80, %s1375_s6, [#allocation5]  }
 0x220   :  { %s1137_s6 = smov [#allocation2]  }
 0x221   :  { %s941_s20 = sshll.u32 %s1137_s6, 4  ;;  %s942_s20 = int_to_ptr.vmem [resolvable:$true] %s941_s20 }
 0x222   :  { %s1106_s21 = scalar_lea.vmem %s942_s20, 80  ;;  %s1110_s22 = scalar_lea.vmem %s942_s20, 96 }
 0x223   :  { %v1067_v47 = vpop.eup %1066  ;;  %p1107_p5 = scmp.ne.s32.totalorder %s942_s20, %s1106_s21  ;;  %p1111_p6 = scmp.lt.s32.totalorder %s942_s20, %s942_s20 }
 0x224   :  { %v1069_v34 = vpop.eup %1068  ;;  %v824_v35 = vadd.f32 1.0, %v1067_v47  ;;  %p1112_p7 = scmp.lt.s32.totalorder %s1110_s22, %s1106_s21 }
 0x225   :  { %v1071_v36 = vpop.eup %1070  ;;  %v826_v39 = vadd.f32 1.0, %v1069_v34 }
 0x226   :  { %v1073_v40 = vpop.eup %1072  ;;  %v825_v2 = vadd.f32 1.0, %v1071_v36  ;;  %1076 = vrcp.f32 %v824_v35  ;;  %p1113_p8 = por %p1112_p7, %p1111_p6 }
 0x227   :  { %v1075_v41 = vpop.eup %1074  ;;  %v827_v42 = vadd.f32 1.0, %v1073_v40  ;;  %1078 = vrcp.f32 %v826_v39 }
 0x228   :  { %v828_v8 = vadd.f32 1.0, %v1075_v41  ;;  %1080 = vrcp.f32 %v825_v2  ;;  %p1114_p9 = pnand %p1113_p8, %p1107_p5 }
 0x229   :  { %1082 = vrcp.f32 %v827_v42 }
 0x22a   :  { %1084 = vrcp.f32 %v828_v8 }
 0x233   :  { %v1077_v9 = vpop.eup %1076 }
 0x234   :  { %v1079_v5 = vpop.eup %1078 }
 0x235   :  { %v1081_v11 = vpop.eup %1080 }
 0x236   :  { %v1083_v46 = vpop.eup %1082  ;;  %v894_v49 = vcombine.low %v1077_v9, %v1081_v11 }
 0x237   :  { %v1085_v19 = vpop.eup %1084  ;;  %v895_v20 = vcombine.low %v1079_v5, %v1083_v46 }
 0x238   :  { %v902_v21 = vrot.slane %v894_v49, %v1342_v4  ;;  %v916_v51 = vrot.slane %v1085_v19, %v1342_v4 }
 0x239   :  { %v909_v50 = vrot.slane %v895_v20, %v1342_v4 }
 0x23a   :  { %v931_v44 = vrot.slane %v916_v51, %v1342_v4 }
 0x23b   :  { %v917_v45 = vcombine.low %v902_v21, %v909_v50 }
 0x23d   :  { %v924_v53 = vrot.slane %v917_v45, %v1342_v4 }
 0x23f   :  { %v932_v55 = vcombine.low %v924_v53, %v931_v44 }
 0x241   :  { %934 = vst.msk [vmem:[#allocation2] sm:$0x1f] %vm1350_vm3, %v932_v55 }
 0x242   :  { %1117 = shalt.err (!%p1114_p9)
}
 0x243   :  { %944 = dma.vmem_to_hbm [thread:$0]  %s942_s20, 80, %s1374_s5, [#allocation3]  }
 0x244   :  { %1126 = dma.done.wait [#allocation3], 80  }
 0x245   :  { %1127 = vsyncadd [#allocation3], 4294967216 }
 0x246   :  { %1128 = dma.done.wait [#allocation5], 80  }
 0x247   :  { %1129 = vsyncadd [#allocation5], 4294967216 }
 0x248   :  { %961 = vsyncpa [#allocation3], 1 }
 0x249   :  { %962 = vsyncpa [#allocation5], 1 }

</bundles_post_ra>
